<compile_context>
chip_gen: v7x
topology: tpu7x:2x2x1
jax: 0.10.0
libtpu: 0.0.40
codegen_flags: <defaults>
</compile_context>

<pallas_src>
import functools

import jax
import jax.numpy as jnp
from jax.experimental import pallas as pl
from jax.experimental.pallas import tpu as pltpu


def _round_up(x, m):
    return (x + m - 1) // m * m


def _conv_matmul_kernel(x_ref, w_ref, b_ref, o_ref):
    # x_ref: (1, tm, K)        tile of flattened patches
    # w_ref: (C_out_p, K)      conv weight in its natural PyTorch flatten
    # b_ref: (C_out_p, 1)      bias column
    # o_ref: (1, C_out_p, tm)  output tile: C_out on sublanes, patches on lanes
    x = x_ref[0]                 # (tm, K)
    w = w_ref[...]               # (Cp, K)
    # Contract K on both operands -> (Cp, tm); f32 accumulation on the MXU.
    # (Same "trans_b" dot_general pattern used by the reference flash-attention
    # TPU kernels.)
    acc = jax.lax.dot_general(
        w, x,
        dimension_numbers=(((1,), (1,)), ((), ())),
        preferred_element_type=jnp.float32,
    )
    acc = acc + b_ref[...]       # (Cp, 1) broadcasts along the lane axis
    o_ref[0] = jnp.maximum(acc, 0.0).astype(o_ref.dtype)


def downsampling_conv_block(x, weight, bias, *, stride=2, tm=512):
    """ReLU(Conv3d(k=stride, s=stride, p=0)) via a Pallas matmul kernel.

    x:      (N, C_in, D, H, W)          float32 (NCDHW, PyTorch layout)
    weight: (C_out, C_in, k, k, k)      float32 (PyTorch Conv3d layout)
    bias:   (C_out,)                    float32
    returns (N, C_out, D//k, H//k, W//k) float32 (NCDHW)
    """
    k = stride
    N, C_in, D, H, W = x.shape
    C_out = weight.shape[0]
    Do, Ho, Wo = D // k, H // k, W // k
    K = C_in * k * k * k
    P = Do * Ho * Wo                       # patches (output voxels) per batch item

    # Patch-tile size = lane width of the output tile: keep a multiple of 128.
    tm = max(128, min(tm, _round_up(P, 128)))
    tm = _round_up(tm, 128)
    P_pad = _round_up(P, tm)
    C_out_p = _round_up(C_out, 8)          # sublane multiple (no 128-pad needed)

    # --- glue: extract non-overlapping k^3 patches (channel-major, matching
    # the (C_out, C_in, kD, kH, kW) weight flatten). ---
    # TODO(synk): fuse this gather into the kernel / keep activations
    # channels-last upstream; it costs one extra HBM read+write of x.
    xp = x.reshape(N, C_in, Do, k, Ho, k, Wo, k)
    xp = jnp.transpose(xp, (0, 2, 4, 6, 1, 3, 5, 7))   # (N, Do, Ho, Wo, C, k, k, k)
    X = xp.reshape(N, P, K)
    if P_pad != P:
        X = jnp.pad(X, ((0, 0), (0, P_pad - P), (0, 0)))

    # Conv weight in its natural flatten (C_out, K); pad C_out to a multiple of 8.
    W_mat = weight.reshape(C_out, K)
    b_col = bias.reshape(C_out, 1)
    if C_out_p != C_out:
        W_mat = jnp.pad(W_mat, ((0, C_out_p - C_out), (0, 0)))
        b_col = jnp.pad(b_col, ((0, C_out_p - C_out), (0, 0)))

    grid = (N, P_pad // tm)

    cost = pl.CostEstimate(
        flops=2 * N * P_pad * K * C_out_p,
        transcendentals=0,
        bytes_accessed=4 * (X.size + W_mat.size + b_col.size + N * C_out_p * P_pad),
    )

    out = pl.pallas_call(
        _conv_matmul_kernel,
        out_shape=jax.ShapeDtypeStruct((N, C_out_p, P_pad), jnp.float32),
        grid_spec=pltpu.PrefetchScalarGridSpec(
            num_scalar_prefetch=0,
            grid=grid,
            in_specs=[
                pl.BlockSpec((1, tm, K), lambda n, i: (n, i, 0)),
                pl.BlockSpec((C_out_p, K), lambda n, i: (0, 0)),
                pl.BlockSpec((C_out_p, 1), lambda n, i: (0, 0)),
            ],
            out_specs=pl.BlockSpec((1, C_out_p, tm), lambda n, i: (n, 0, i)),
        ),
        compiler_params=pltpu.CompilerParams(
            dimension_semantics=("parallel", "parallel")),
        cost_estimate=cost,
    )(X, W_mat, b_col)

    # Output is already channel-major; NCDHW is a free contiguous reshape.
    y = out[:, :C_out, :P].reshape(N, C_out, Do, Ho, Wo)
    return y


def _reference(x, weight, bias, stride=2):
    # Pure-JAX reference for verification (NCDHW conv).
    y = jax.lax.conv_general_dilated(
        x, weight,
        window_strides=(stride, stride, stride),
        padding="VALID",
        dimension_numbers=("NCDHW", "OIDHW", "NCDHW"),
    )
    y = y + bias.reshape(1, -1, 1, 1, 1)
    return jnp.maximum(y, 0.0)


if __name__ == "__main__":
    key = jax.random.PRNGKey(0)
    k_x, k_w, k_b = jax.random.split(key, 3)

    # Small shapes consistent with the module: N=2, C_in=4, C_out=8, spatial=16, stride=2.
    N, C_in, C_out, S, stride = 2, 4, 8, 16, 2
    x = jax.random.normal(k_x, (N, C_in, S, S, S), dtype=jnp.float32)
    weight = jax.random.normal(
        k_w, (C_out, C_in, stride, stride, stride), dtype=jnp.float32) * 0.1
    bias = jax.random.normal(k_b, (C_out,), dtype=jnp.float32) * 0.1

    # tm=256 keeps 4 parallel grid steps at this small demo size (2 per TC on
    # v7x); at production sizes use the default tm=512 or larger.
    fn = jax.jit(functools.partial(downsampling_conv_block, stride=stride, tm=256))
    y = fn(x, weight, bias)
    jax.block_until_ready(y)

    y_ref = _reference(x, weight, bias, stride=stride)
    assert y.shape == (N, C_out, S // stride, S // stride, S // stride)
    assert jnp.allclose(y, y_ref, atol=1e-4, rtol=1e-4), float(
        jnp.max(jnp.abs(y - y_ref)))

    print("KERNEL_OK")
</pallas_src>

<mosaic_0001>
module attributes {stable_mosaic.version = 11 : i64} {
  func.func @_conv_matmul_kernel(%arg0: i32, %arg1: i32, %arg2: memref<1x256x32xf32, #tpu.memory_space<vmem>>, %arg3: memref<8x32xf32, #tpu.memory_space<vmem>>, %arg4: memref<8x1xf32, #tpu.memory_space<vmem>>, %arg5: memref<1x8x256xf32, #tpu.memory_space<vmem>>) attributes {dimension_semantics = [#tpu.dimension_semantics<parallel>, #tpu.dimension_semantics<parallel>], iteration_bounds = array<i64: 2, 2>, scalar_prefetch = 0 : i64, scratch_operands = 0 : i64, tpu.core_type = #tpu.core_type<tc>, window_params = [{transform_indices = @transform_0, window_bounds = array<i64: 1, 256, 32>}, {pipeline_mode = #tpu.pipeline_mode<synchronous>, transform_indices = @transform_1, window_bounds = array<i64: 8, 32>}, {pipeline_mode = #tpu.pipeline_mode<synchronous>, transform_indices = @transform_2, window_bounds = array<i64: 8, 1>}, {transform_indices = @transform_3, window_bounds = array<i64: 1, 8, 256>}]} {
    %c0 = arith.constant 0 : index
    %c0_0 = arith.constant 0 : index
    %c0_1 = arith.constant 0 : index
    %0 = vector.load %arg2[%c0, %c0_0, %c0_1] : memref<1x256x32xf32, #tpu.memory_space<vmem>>, vector<1x256x32xf32>
    %1 = vector.shape_cast %0 : vector<1x256x32xf32> to vector<256x32xf32>
    %c0_2 = arith.constant 0 : index
    %c0_3 = arith.constant 0 : index
    %2 = vector.load %arg3[%c0_2, %c0_3] : memref<8x32xf32, #tpu.memory_space<vmem>>, vector<8x32xf32>
    %cst = arith.constant dense<0.000000e+00> : vector<8x256xf32>
    %3 = tpu.matmul %2, %1, %cst {dimension_numbers = #tpu.dot_dimension_numbers<[1], [1], [0], [0], [0, 0, 1, 0], [], []>} : vector<8x32xf32>, vector<256x32xf32>, vector<8x256xf32> -> vector<8x256xf32>
    %c0_4 = arith.constant 0 : index
    %c0_5 = arith.constant 0 : index
    %4 = vector.load %arg4[%c0_4, %c0_5] : memref<8x1xf32, #tpu.memory_space<vmem>>, vector<8x1xf32>
    %5 = vector.broadcast %4 : vector<8x1xf32> to vector<8x256xf32>
    %6 = arith.addf %3, %5 : vector<8x256xf32>
    %cst_6 = arith.constant 0.000000e+00 : f32
    %7 = vector.broadcast %cst_6 : f32 to vector<8x256xf32>
    %8 = arith.maximumf %6, %7 : vector<8x256xf32>
    %c0_7 = arith.constant 0 : index
    %c0_8 = arith.constant 0 : index
    %c0_9 = arith.constant 0 : index
    %9 = vector.load %arg5[%c0_7, %c0_8, %c0_9] : memref<1x8x256xf32, #tpu.memory_space<vmem>>, vector<1x8x256xf32>
    %10 = vector.shape_cast %9 : vector<1x8x256xf32> to vector<8x256xf32>
    %11 = vector.shape_cast %8 : vector<8x256xf32> to vector<1x8x256xf32>
    tpu.vector_store %arg5[%c0_7, %c0_8, %c0_9], %11 {strides = array<i32>} : memref<1x8x256xf32, #tpu.memory_space<vmem>>, vector<1x8x256xf32>,
    return
  }
  func.func @transform_0(%arg0: i32, %arg1: i32) -> (i32, i32, i32) {
    %c0_i32 = arith.constant 0 : i32
    %c0_i32_0 = arith.constant 0 : i32
    return %arg0, %arg1, %c0_i32 : i32, i32, i32
  }
  func.func @transform_1(%arg0: i32, %arg1: i32) -> (i32, i32) {
    %c0_i32 = arith.constant 0 : i32
    %c0_i32_0 = arith.constant 0 : i32
    %c0_i32_1 = arith.constant 0 : i32
    return %c0_i32, %c0_i32_0 : i32, i32
  }
  func.func @transform_2(%arg0: i32, %arg1: i32) -> (i32, i32) {
    %c0_i32 = arith.constant 0 : i32
    %c0_i32_0 = arith.constant 0 : i32
    %c0_i32_1 = arith.constant 0 : i32
    return %c0_i32, %c0_i32_0 : i32, i32
  }
  func.func @transform_3(%arg0: i32, %arg1: i32) -> (i32, i32, i32) {
    %c0_i32 = arith.constant 0 : i32
    %c0_i32_0 = arith.constant 0 : i32
    return %arg0, %c0_i32, %arg1 : i32, i32, i32
  }
}

</mosaic_0001>

<bundles_post_ra>
// kernel: downsampling_conv_block.1
= control target key start
LH: loop header
LB: loop body
LE: loop exit
PB: predicated region body
PF: predicated region fallthrough
CT: control target
= control target key end

     0   :  { %s745_s12 = smov 0   ;;  %s747_s13 = smov 0   ;;  %s888_s0 = inlined_call_operand.vmem [shape: f32[2,512,32], index: 0, kind: input, shape index: {}]   ;;  %s889_s1 = inlined_call_operand.vmem [shape: f32[8,32], index: 1, kind: input, shape index: {}]   ;;  %s890_s2 = inlined_call_operand.vmem [shape: f32[8,1], index: 2, kind: input, shape index: {}]   ;;  %s891_s3 = inlined_call_operand.vmem [shape: f32[2,8,512], index: 3, kind: output, shape index: {}]  }
   0x1   :  { %s749_s14 = smov 0   ;;  %s751_s15 = smov 0  }
   0x2   :  { %s753_s16 = smov 0  }
   0x3 LB: > { %s22_s17 = sadd.s32 1, %s714_s14  ;;  %s25_s18 = sadd.s32 1, %s718_s15  ;;  %s722_s16 = sphi %s753_s16, %s13_s16   ;;  %s718_s15 = sphi %s751_s15, %s897_s15   ;;  %s714_s14 = sphi %s749_s14, %s896_s14   ;;  %s710_s13 = sphi %s747_s13, %s895_s13   ;;  %s706_s12 = sphi %s745_s12, %s894_s12  }
   0x4   : > { %p23_p0 = scmp.ge.s32.totalorder %s22_s17, 2  ;;  %p518_p1 = scmp.ge.s32.totalorder %s722_s16, 1 }
   0x5   : > { %p158_p2 = scmp.lt.s32.totalorder %s722_s16, 5 }
   0x6   : > { %s899_s17 = smov (%p23_p0, %s22_s17), 0  ;;  %s901_s18 = smov (!%p23_p0, %s25_s18), %s718_s15 }
   0x7   : > { %p159_p3 = pnand %p518_p1, %p158_p2  ;;  %p27_p4 = scmp.ge.s32.totalorder %s901_s18, 2 }
   0x8   : > { %s519_s19 = sshll.u32 (!%p159_p3), %s706_s12, 5  ;;  %p191_p5 = scmp.lt.s32.totalorder (!%p159_p3), %s710_s13, 1  ;;  %vm249_vm0 = vcmask (!%p159_p3), 261120   ;;  %v781_v0 = vld [vmem:[%s889_s1] sm:$0xff] (!%p159_p3)  ;;  %v724_v2 = vmov (!%p159_p3), 0  }
   0x9   : > { %s903_s18 = smov (%p27_p4, %s901_s18), 0  ;;  %162 = sbr.rel (%p159_p3) target bundleno = 306 (0x132), region = 32 }
   0xa   : > { %v243_v1 = vld [vmem:[%s890_s2] sm:$0xff] (!%p159_p3)  ;;  %p193_p6 = scmp.lt.s32.totalorder (!%p159_p3), %s519_s19, 63  ;;  %592 = vmatprep.mubr.msk.f32.mxu0 (!%p159_p3), %vm249_vm0, %v781_v0  ;;  %683 = vset.pattern.permute.xlu0 (!%p159_p3), %v724_v2  ;;  %vm798_vm1 = vmpackc.low (!%p159_p3), %vm249_vm0, %vm249_vm0  ;;  %s522_s30 = sshll.u32 (!%p159_p3), %s706_s12, 1 }
   0xb   : > { %246 = vperm.xlu0 (!%p159_p3), %683, %v243_v1   ;;  %p203_p7 = scmp.lt.s32.totalorder (!%p159_p3), %s522_s30, 3 }
  0x10   : > { %s905_s13 = smov (!%p191_p5, %s710_s13), 1  ;;  %s907_s19 = smov (!%p193_p6, %s519_s19), 63 }
  0x11   : > { %s520_s24 = sshll.u32 %s905_s13, 6  ;;  %s909_s30 = smov (!%p203_p7, %s522_s30), 3 }
  0x12   : > { %s196_s25 = sadd.s32 %s520_s24, %s907_s19  ;;  %s523_s4 = sshll.u32 %s905_s13, 2 }
  0x13   : > { %s521_s26 = sshll.u32 %s196_s25, 3  ;;  %s206_s5 = sadd.s32 %s523_s4, %s909_s30 }
  0x14   : > { %s794_s29 = scalar_lea.vmem %s888_s0, %s521_s26  ;;  %s524_s6 = sshll.u32 %s206_s5, 3 }
  0x15   : > { %v226_v4 = vld [vmem:[%s794_s29 + $0x80] sm:$0xff]  ;;  %v227_v5 = vld [vmem:[%s794_s29 + $0x88] sm:$0xff]  ;;  %v228_v9 = vld [vmem:[%s794_s29 + $0x90] sm:$0xff]  ;;  %s208_s9 = scalar_lea.vmem %s891_s3, %s524_s6 }
  0x16   : > { %v210_v6 = vld [vmem:[%s794_s29] sm:$0xff]  ;;  %v594_v7 = vpack.c.bf16 %v227_v5, %v226_v4  ;;  %v211_v8 = vld [vmem:[%s794_s29 + $0x8] sm:$0xff]  ;;  %v229_v10 = vld [vmem:[%s794_s29 + $0x98] sm:$0xff] }
  0x17   : > { %v597_v11 = vpack.c.bf16 %v211_v8, %v210_v6  ;;  %v600_v12 = vpack.c.bf16 %v229_v10, %v228_v9  ;;  %v212_v13 = vld [vmem:[%s794_s29 + $0x10] sm:$0xff]  ;;  %v213_v14 = vld [vmem:[%s794_s29 + $0x18] sm:$0xff]  ;;  %v230_v15 = vld [vmem:[%s794_s29 + $0xa0] sm:$0xff] }
  0x18   : > { %596 = vmatprep.subr.msk.bf16.mxu0 %vm798_vm1, %v594_v7  ;;  %v231_v16 = vld [vmem:[%s794_s29 + $0xa8] sm:$0xff]  ;;  %v603_v17 = vpack.c.bf16 %v213_v14, %v212_v13  ;;  %v214_v19 = vld [vmem:[%s794_s29 + $0x20] sm:$0xff]  ;;  %v232_v21 = vld [vmem:[%s794_s29 + $0xb0] sm:$0xff] }
  0x19   : > { %599 = vmatpush3.bf16.xpose.msk.msra.mxu0 %vm798_vm1, %v597_v11  ;;  %v606_v18 = vpack.c.bf16 %v231_v16, %v230_v15  ;;  %v215_v20 = vld [vmem:[%s794_s29 + $0x28] sm:$0xff]  ;;  %v233_v22 = vld [vmem:[%s794_s29 + $0xb8] sm:$0xff]  ;;  %v216_v25 = vld [vmem:[%s794_s29 + $0x30] sm:$0xff] }
  0x1a   : > { %602 = vmatprep.subr.msk.bf16.mxu0 %vm798_vm1, %v600_v12  ;;  %v609_v23 = vpack.c.bf16 %v215_v20, %v214_v19  ;;  %v612_v24 = vpack.c.bf16 %v233_v22, %v232_v21  ;;  %v217_v26 = vld [vmem:[%s794_s29 + $0x38] sm:$0xff]  ;;  %v234_v27 = vld [vmem:[%s794_s29 + $0xc0] sm:$0xff]  ;;  %v235_v28 = vld [vmem:[%s794_s29 + $0xc8] sm:$0xff] }
  0x1b   : > { %v615_v29 = vpack.c.bf16 %v217_v26, %v216_v25  ;;  %v618_v30 = vpack.c.bf16 %v235_v28, %v234_v27  ;;  %v218_v31 = vld [vmem:[%s794_s29 + $0x40] sm:$0xff]  ;;  %v219_v32 = vld [vmem:[%s794_s29 + $0x48] sm:$0xff]  ;;  %v236_v33 = vld [vmem:[%s794_s29 + $0xd0] sm:$0xff] }
  0x1c   : > { %v237_v34 = vld [vmem:[%s794_s29 + $0xd8] sm:$0xff]  ;;  %v621_v35 = vpack.c.bf16 %v219_v32, %v218_v31  ;;  %v220_v37 = vld [vmem:[%s794_s29 + $0x50] sm:$0xff]  ;;  %v238_v39 = vld [vmem:[%s794_s29 + $0xe0] sm:$0xff] }
  0x1d   : > { %v624_v36 = vpack.c.bf16 %v237_v34, %v236_v33  ;;  %v221_v38 = vld [vmem:[%s794_s29 + $0x58] sm:$0xff]  ;;  %v239_v40 = vld [vmem:[%s794_s29 + $0xe8] sm:$0xff]  ;;  %v222_v43 = vld [vmem:[%s794_s29 + $0x60] sm:$0xff] }
  0x1e   : > { %v627_v41 = vpack.c.bf16 %v221_v38, %v220_v37  ;;  %v630_v42 = vpack.c.bf16 %v239_v40, %v238_v39  ;;  %v223_v44 = vld [vmem:[%s794_s29 + $0x68] sm:$0xff]  ;;  %v240_v45 = vld [vmem:[%s794_s29 + $0xf0] sm:$0xff]  ;;  %v241_v46 = vld [vmem:[%s794_s29 + $0xf8] sm:$0xff] }
  0x1f   : > { %v633_v47 = vpack.c.bf16 %v223_v44, %v222_v43  ;;  %v636_v48 = vpack.c.bf16 %v241_v46, %v240_v45  ;;  %v224_v49 = vld [vmem:[%s794_s29 + $0x70] sm:$0xff]  ;;  %v225_v50 = vld [vmem:[%s794_s29 + $0x78] sm:$0xff] }
  0x20   : > { %v639_v51 = vpack.c.bf16 %v225_v50, %v224_v49 }
  0x21   : > { %605 = vmatpush3.bf16.xpose.msk.msra.mxu0 %vm798_vm1, %v603_v17 }
  0x22   : > { %608 = vmatprep.subr.msk.bf16.mxu0 %vm798_vm1, %v606_v18 }
  0x29   : > { %611 = vmatpush3.bf16.xpose.msk.msra.mxu0 %vm798_vm1, %v609_v23 }
  0x2a   : > { %614 = vmatprep.subr.msk.bf16.mxu0 %vm798_vm1, %v612_v24 }
  0x31   : > { %617 = vmatpush3.bf16.xpose.msk.msra.mxu0 %vm798_vm1, %v615_v29 }
  0x32   : > { %620 = vmatprep.subr.msk.bf16.mxu0 %vm798_vm1, %v618_v30 }
  0x39   : > { %623 = vmatpush3.bf16.xpose.msk.msra.mxu0 %vm798_vm1, %v621_v35 }
  0x3a   : > { %626 = vmatprep.subr.msk.bf16.mxu0 %vm798_vm1, %v624_v36 }
  0x41   : > { %629 = vmatpush3.bf16.xpose.msk.msra.mxu0 %vm798_vm1, %v627_v41 }
  0x42   : > { %632 = vmatprep.subr.msk.bf16.mxu0 %vm798_vm1, %v630_v42 }
  0x49   : > { %635 = vmatpush3.bf16.xpose.msk.msra.mxu0 %vm798_vm1, %v633_v47 }
  0x4a   : > { %638 = vmatprep.subr.msk.bf16.mxu0 %vm798_vm1, %v636_v48 }
  0x51   : > { %641 = vmatpush3.bf16.xpose.msk.msra.mxu0 %vm798_vm1, %v639_v51 }
  0x58   : > { %593 = vmatmul.mubr.msk.f32.vlgmr.msra.gmra.mrb[0].mxu0 %vm249_vm0, %v781_v0 }
  0x8a   : > { %v247_v52 = vpop.permute.xlu0 %246 }
 0x12b   : > { %v415_v53 = vpop.f32.mrb[0].mxu0 }
 0x12c   : > { %v416_v54 = vadd.f32 %v415_v53, %v247_v52  ;;  %v417_v55 = vpop.f32.mrb[1].mxu0 }
 0x12d   : > { %v418_v56 = vadd.f32 %v417_v55, %v247_v52 }
 0x12e   : > { %v420_v57 = vmax.f32 %v416_v54, 0.0 }
 0x12f   : > { %v421_v58 = vmax.f32 %v418_v56, 0.0 }
 0x130   : > { %422 = vst [vmem:[%s208_s9] sm:$0xff] %v420_v57 }
 0x131   : > { %423 = vst [vmem:[%s208_s9 + $0x8] sm:$0xff] %v421_v58 }
 0x132 PF: > { %s13_s16 = sadd.s32 1, %s722_s16   ;;  %s894_s12 = smov %s714_s14 }
 0x133   : > { %p10_p8 = scmp.ge.s32.totalorder %s13_s16, 6   ;;  %s895_s13 = smov %s718_s15 }
 0x134   : > { %s896_s14 = smov %s899_s17  ;;  %s897_s15 = smov %s903_s18 }
 0x135   :  { %12 = sbr.rel (!%p10_p8) target bundleno = 3 (0x3), region = 62 }

</bundles_post_ra>
